<compile_context>
chip_gen: v6e
topology: v6e:2x2x1
jax: 0.10.0
libtpu: 0.0.40
codegen_flags: <defaults>
</compile_context>

<pallas_src>
import functools
import math

import jax
import jax.numpy as jnp
from jax import lax
from jax.experimental import pallas as pl
from jax.experimental.pallas import tpu as pltpu

BN_EPS = 1e-5
_LANE = 128


def _mlp_kernel(x_ref, w_ref, bgb_ref, o_ref, *, bn: bool, act: bool,
                tk: int, x_resident: bool):
    """Grid = (N tiles ["parallel"], K tiles ["arbitrary", reduction, last]).

    x_ref:   (B, Kpad) resident  OR  (B, tk) streamed chunk      (compute dtype)
    w_ref:   (tn, tk)  weight chunk, PyTorch layout (dim_out, dim_in) (compute dtype)
    bgb_ref: (3, tn)   rows = [bias, gamma, beta], f32
    o_ref:   (B, tn)   f32 output block; also the K-axis resident accumulator.
    """
    k = pl.program_id(1)

    @pl.when(k == 0)
    def _():
        # Fold the bias add into the (mandatory) init store: one fewer epilogue pass.
        o_ref[...] = jnp.broadcast_to(bgb_ref[0:1, :], o_ref.shape)

    if x_resident:
        start = pl.multiple_of(k * tk, tk)
        x_chunk = x_ref[:, pl.ds(start, tk)]
    else:
        x_chunk = x_ref[...]

    # x @ W.T without materializing W.T: contract dim 1 of both operands on the MXU.
    o_ref[...] += lax.dot_general(
        x_chunk, w_ref[...],
        dimension_numbers=(((1,), (1,)), ((), ())),
        preferred_element_type=jnp.float32,
    )

    @pl.when(k == pl.num_programs(1) - 1)
    def _():
        y = o_ref[...]
        if bn:
            # BatchNorm1d training mode: biased batch statistics over the batch axis.
            # Stats are per-feature, so tiling the feature (N) axis is exact; the batch
            # axis is deliberately NOT tiled, which keeps the statistics exact.
            mean = jnp.mean(y, axis=0, keepdims=True)
            var = jnp.mean((y - mean) * (y - mean), axis=0, keepdims=True)
            y = (y - mean) * lax.rsqrt(var + BN_EPS)
            y = y * bgb_ref[1:2, :] + bgb_ref[2:3, :]    # gamma, beta
        if act:
            y = jnp.maximum(y, 0.0)
        o_ref[...] = y


def _vmem_capacity_bytes() -> int:
    """Physical VMEM per core; conservative 64 MiB (v7x) if the query is unavailable."""
    try:
        info = pltpu.get_tpu_info()
        cap = getattr(info, "vmem_capacity_bytes", None)
        if cap:
            return int(cap)
    except Exception:
        pass
    return 64 << 20


def _largest_divisor_tile(dim: int, want: int) -> int:
    """Largest multiple of 128 that divides `dim` (itself a multiple of 128) and is <= want."""
    want = max(_LANE, min(want, dim))
    t = (want // _LANE) * _LANE
    while t > _LANE:
        if dim % t == 0:
            return t
        t -= _LANE
    return _LANE


def _pad_to(arr, axis: int, mult: int):
    size = arr.shape[axis]
    pad = (-size) % mult
    if pad == 0:
        return arr
    widths = [(0, 0)] * arr.ndim
    widths[axis] = (0, pad)
    return jnp.pad(arr, widths)


def mlp_layer_forward(x, weight, bias, gamma, beta, *, bn=True, act=True,
                      tn=None, tk=None):
    """MLPLayer forward: relu(BN_train(x @ W.T + b)). Returns (B, dim_out) f32.

    x: (B, dim_in). weight: (dim_out, dim_in), PyTorch layout, stored in the desired
    matmul dtype (f32 or bf16). The weight is NOT cast here (a per-call cast re-streams
    the full weight through HBM and negates the bandwidth win); only x is cast to
    weight.dtype. Accumulation and the BN/ReLU epilogue are always f32.
    """
    B, K = x.shape
    N, K2 = weight.shape
    assert K == K2, "weight must be (dim_out, dim_in)"

    compute_dtype = weight.dtype
    isz = jnp.dtype(compute_dtype).itemsize

    # Pad N / K up to lane multiples. Zero pads are exact for the matmul; padded output
    # features are sliced off below (their BN stats are independent of the real ones).
    x_p = _pad_to(x.astype(compute_dtype), 1, _LANE)
    w_p = _pad_to(_pad_to(weight, 1, _LANE), 0, _LANE)
    Kpad = x_p.shape[1]
    Npad = w_p.shape[0]

    # Fold bias / BN gamma / BN beta into a single (3, Npad) f32 operand.
    bgb = jnp.stack([bias.astype(jnp.float32),
                     gamma.astype(jnp.float32),
                     beta.astype(jnp.float32)], axis=0)
    bgb = _pad_to(bgb, 1, _LANE)

    capacity = _vmem_capacity_bytes()
    budget = min(48 << 20, (capacity * 3) // 4)      # tile budget, v7x-safe

    # Big tiles by default: the kernel is weight-HBM-stream bound at small B, so amortize
    # the ~0.35 us/step grid overhead with >= 512 (f32) / 1024 (bf16) blocks.
    want = 1024 if isz <= 2 else 512
    tk_ = _largest_divisor_tile(Kpad, tk if tk is not None else want)
    tn_ = _largest_divisor_tile(Npad, tn if tn is not None else want)

    # Keep >= 2 N tiles (when N allows) so the "parallel" axis shards across v7x's 2 TCs.
    if Npad >= 2 * _LANE and Npad // tn_ < 2:
        tn_ = _largest_divisor_tile(Npad, Npad // 2)

    x_resident = 2 * B * Kpad * isz <= budget // 4

    def usage(tn_v, tk_v, xres):
        w_b = 2 * tn_v * tk_v * isz                   # W double-buffer
        x_b = 2 * B * (Kpad if xres else tk_v) * isz  # x (resident or streamed)
        o_b = 2 * B * tn_v * 4                        # f32 output/accumulator block
        s_b = 2 * 3 * tn_v * 4                        # bias/gamma/beta block
        return w_b + x_b + o_b + s_b

    # Shrink toward the budget: tk first (weight stream), then drop resident x, then tn.
    while usage(tn_, tk_, x_resident) > budget and tk_ > _LANE:
        tk_ = _largest_divisor_tile(Kpad, tk_ - _LANE)
    if usage(tn_, tk_, x_resident) > budget and x_resident:
        x_resident = False
    while usage(tn_, tk_, x_resident) > budget and tn_ > _LANE:
        tn_ = _largest_divisor_tile(Npad, tn_ - _LANE)

    vmem_need = usage(tn_, tk_, x_resident)
    vmem_limit = int(min(capacity - (4 << 20),
                         max(int(vmem_need * 1.5) + (4 << 20), 32 << 20)))

    n_tiles_n = Npad // tn_
    cost = pl.CostEstimate(
        flops=2 * B * Npad * Kpad,
        transcendentals=0,
        bytes_accessed=(Npad * Kpad * isz
                        + B * Kpad * isz * (1 if x_resident else n_tiles_n)
                        + B * Npad * 4
                        + 3 * Npad * 4),
    )

    if x_resident:
        x_spec = pl.BlockSpec((B, Kpad), lambda n, k: (0, 0))   # stays VMEM-resident
    else:
        x_spec = pl.BlockSpec((B, tk_), lambda n, k: (0, k))

    kernel = functools.partial(_mlp_kernel, bn=bn, act=act, tk=tk_,
                               x_resident=x_resident)

    out = pl.pallas_call(
        kernel,
        out_shape=jax.ShapeDtypeStruct((B, Npad), jnp.float32),
        grid_spec=pltpu.PrefetchScalarGridSpec(
            num_scalar_prefetch=0,
            grid=(n_tiles_n, Kpad // tk_),                        # (parallel N, reduce K)
            in_specs=[
                x_spec,                                           # x
                pl.BlockSpec((tn_, tk_), lambda n, k: (n, k)),    # W chunk (no transpose)
                pl.BlockSpec((3, tn_), lambda n, k: (0, n)),      # [bias; gamma; beta]
            ],
            out_specs=pl.BlockSpec((B, tn_), lambda n, k: (0, n)),  # resident accumulator
        ),
        compiler_params=pltpu.CompilerParams(
            dimension_semantics=("parallel", "arbitrary"),
            vmem_limit_bytes=vmem_limit,
        ),
        cost_estimate=cost,
    )(x_p, w_p, bgb)

    return out[:, :N] if Npad != N else out


def _orthogonal(key, rows, cols):
    """Matches nn.init.orthogonal_: the smaller dimension is orthonormal."""
    big, small = max(rows, cols), min(rows, cols)
    a = jax.random.normal(key, (big, small), dtype=jnp.float32)
    q, r = jnp.linalg.qr(a)
    q = q * jnp.sign(jnp.diag(r))[None, :]
    return q if rows >= cols else q.T


def init_params(key, dim_in, dim_out):
    """Deterministic init matching the module's __init__.

    Linear.weight: orthogonal; Linear.bias: U(-1/sqrt(fan_in), 1/sqrt(fan_in)).
    BatchNorm1d: gamma=1, beta=0 (PyTorch default; param_init only touches BatchNorm2d).
    """
    kw, kb = jax.random.split(key)
    weight = _orthogonal(kw, dim_out, dim_in).astype(jnp.float32)   # (dim_out, dim_in)
    bound = 1.0 / math.sqrt(dim_in)
    bias = jax.random.uniform(kb, (dim_out,), minval=-bound, maxval=bound,
                              dtype=jnp.float32)
    gamma = jnp.ones((dim_out,), jnp.float32)
    beta = jnp.zeros((dim_out,), jnp.float32)
    return weight, bias, gamma, beta


def reference_forward(x, weight, bias, gamma, beta, bn=True, act=True):
    y = x @ weight.T + bias
    if bn:
        mean = jnp.mean(y, axis=0, keepdims=True)
        var = jnp.mean((y - mean) ** 2, axis=0, keepdims=True)
        y = (y - mean) / jnp.sqrt(var + BN_EPS) * gamma + beta
    if act:
        y = jnp.maximum(y, 0.0)
    return y


if __name__ == "__main__":
    key = jax.random.PRNGKey(0)
    kx, kp, kx2, kp2 = jax.random.split(key, 4)

    # --- lane-aligned shapes, f32 weight stream ---
    B, DIM_IN, DIM_OUT = 8, 256, 256
    x = jax.random.normal(kx, (B, DIM_IN), dtype=jnp.float32)
    weight, bias, gamma, beta = init_params(kp, DIM_IN, DIM_OUT)

    ref = reference_forward(x, weight, bias, gamma, beta)
    out = jax.block_until_ready(mlp_layer_forward(x, weight, bias, gamma, beta))
    assert out.shape == (B, DIM_OUT)
    assert jnp.allclose(out, ref, atol=1e-4, rtol=1e-4), "f32 kernel mismatch vs reference"

    # --- bf16 weight stream: cast ONCE outside the hot path; f32 accumulate + BN/ReLU ---
    weight_bf16 = weight.astype(jnp.bfloat16)
    out_bf16 = jax.block_until_ready(
        mlp_layer_forward(x, weight_bf16, bias, gamma, beta))
    assert out_bf16.shape == (B, DIM_OUT)
    assert jnp.allclose(out_bf16, ref, atol=1e-1, rtol=1e-1), "bf16 kernel mismatch vs reference"

    # --- awkward (non-128-multiple) dims exercise the pad + output-slice path ---
    B2, DIM_IN2, DIM_OUT2 = 8, 200, 300
    x2 = jax.random.normal(kx2, (B2, DIM_IN2), dtype=jnp.float32)
    w2, b2, g2, bt2 = init_params(kp2, DIM_IN2, DIM_OUT2)
    ref2 = reference_forward(x2, w2, b2, g2, bt2)
    out2 = jax.block_until_ready(mlp_layer_forward(x2, w2, b2, g2, bt2))
    assert out2.shape == (B2, DIM_OUT2)
    assert jnp.allclose(out2, ref2, atol=1e-4, rtol=1e-4), "padded-dims kernel mismatch"

    print("KERNEL_OK")
</pallas_src>

<mosaic_0001>
module attributes {stable_mosaic.version = 11 : i64} {
  func.func @_mlp_kernel(%arg0: i32, %arg1: i32, %arg2: memref<8x256xf32, #tpu.memory_space<vmem>>, %arg3: memref<128x256xf32, #tpu.memory_space<vmem>>, %arg4: memref<3x128xf32, #tpu.memory_space<vmem>>, %arg5: memref<8x128xf32, #tpu.memory_space<vmem>>) attributes {dimension_semantics = [#tpu.dimension_semantics<parallel>, #tpu.dimension_semantics<arbitrary>], iteration_bounds = array<i64: 2, 1>, scalar_prefetch = 0 : i64, scratch_operands = 0 : i64, tpu.core_type = #tpu.core_type<tc>, window_params = [{pipeline_mode = #tpu.pipeline_mode<synchronous>, transform_indices = @transform_0, window_bounds = array<i64: 8, 256>}, {transform_indices = @transform_1, window_bounds = array<i64: 128, 256>}, {transform_indices = @transform_2, window_bounds = array<i64: 3, 128>}, {transform_indices = @transform_3, window_bounds = array<i64: 8, 128>}]} {
    %c0_i32 = arith.constant 0 : i32
    %0 = arith.cmpi eq, %arg1, %c0_i32 : i32
    %1 = arith.extui %0 : i1 to i32
    %c0_i32_0 = arith.constant 0 : i32
    %2 = arith.cmpi ne, %1, %c0_i32_0 : i32
    scf.if %2 {
      %c0_9 = arith.constant 0 : index
      %c0_10 = arith.constant 0 : index
      %15 = vector.load %arg4[%c0_9, %c0_10] : memref<3x128xf32, #tpu.memory_space<vmem>>, vector<1x128xf32>
      %16 = vector.shape_cast %15 : vector<1x128xf32> to vector<1x128xf32>
      %17 = vector.broadcast %16 : vector<1x128xf32> to vector<8x128xf32>
      %c0_11 = arith.constant 0 : index
      %c0_12 = arith.constant 0 : index
      %18 = vector.load %arg5[%c0_11, %c0_12] : memref<8x128xf32, #tpu.memory_space<vmem>>, vector<8x128xf32>
      tpu.vector_store %arg5[%c0_11, %c0_12], %17 {strides = array<i32>} : memref<8x128xf32, #tpu.memory_space<vmem>>, vector<8x128xf32>,
    } else {
    }
    %c256_i32 = arith.constant 256 : i32
    %3 = arith.muli %arg1, %c256_i32 : i32
    %4 = tpu.assume_multiple %3, 256 : i32
    %c0 = arith.constant 0 : index
    %5 = arith.index_cast %4 : i32 to index
    %6 = vector.load %arg2[%c0, %5] : memref<8x256xf32, #tpu.memory_space<vmem>>, vector<8x256xf32>
    %c0_1 = arith.constant 0 : index
    %c0_2 = arith.constant 0 : index
    %7 = vector.load %arg5[%c0_1, %c0_2] : memref<8x128xf32, #tpu.memory_space<vmem>>, vector<8x128xf32>
    %c0_3 = arith.constant 0 : index
    %c0_4 = arith.constant 0 : index
    %8 = vector.load %arg3[%c0_3, %c0_4] : memref<128x256xf32, #tpu.memory_space<vmem>>, vector<128x256xf32>
    %cst = arith.constant dense<0.000000e+00> : vector<8x128xf32>
    %9 = tpu.matmul %6, %8, %cst {dimension_numbers = #tpu.dot_dimension_numbers<[1], [1], [0], [0], [0, 0, 1, 0], [], []>} : vector<8x256xf32>, vector<128x256xf32>, vector<8x128xf32> -> vector<8x128xf32>
    %10 = arith.addf %7, %9 : vector<8x128xf32>
    %c0_5 = arith.constant 0 : index
    %c0_6 = arith.constant 0 : index
    %11 = vector.load %arg5[%c0_5, %c0_6] : memref<8x128xf32, #tpu.memory_space<vmem>>, vector<8x128xf32>
    tpu.vector_store %arg5[%c0_5, %c0_6], %10 {strides = array<i32>} : memref<8x128xf32, #tpu.memory_space<vmem>>, vector<8x128xf32>,
    %c0_i32_7 = arith.constant 0 : i32
    %12 = arith.cmpi eq, %arg1, %c0_i32_7 : i32
    %13 = arith.extui %12 : i1 to i32
    %c0_i32_8 = arith.constant 0 : i32
    %14 = arith.cmpi ne, %13, %c0_i32_8 : i32
    scf.if %14 {
      %c0_9 = arith.constant 0 : index
      %c0_10 = arith.constant 0 : index
      %15 = vector.load %arg5[%c0_9, %c0_10] : memref<8x128xf32, #tpu.memory_space<vmem>>, vector<8x128xf32>
      %cst_11 = arith.constant dense<0.000000e+00> : vector<128xf32>
      %16 = vector.multi_reduction <add>, %15, %cst_11 [0] : vector<8x128xf32> to vector<128xf32>
      %17 = vector.shape_cast %16 : vector<128xf32> to vector<1x128xf32>
      %cst_12 = arith.constant 8.000000e+00 : f32
      %18 = vector.broadcast %cst_12 : f32 to vector<1x128xf32>
      %19 = arith.divf %17, %18 : vector<1x128xf32>
      %20 = vector.broadcast %19 : vector<1x128xf32> to vector<8x128xf32>
      %21 = arith.subf %15, %20 : vector<8x128xf32>
      %22 = vector.broadcast %19 : vector<1x128xf32> to vector<8x128xf32>
      %23 = arith.subf %15, %22 : vector<8x128xf32>
      %24 = arith.mulf %21, %23 : vector<8x128xf32>
      %cst_13 = arith.constant dense<0.000000e+00> : vector<128xf32>
      %25 = vector.multi_reduction <add>, %24, %cst_13 [0] : vector<8x128xf32> to vector<128xf32>
      %26 = vector.shape_cast %25 : vector<128xf32> to vector<1x128xf32>
      %cst_14 = arith.constant 8.000000e+00 : f32
      %27 = vector.broadcast %cst_14 : f32 to vector<1x128xf32>
      %28 = arith.divf %26, %27 : vector<1x128xf32>
      %29 = vector.broadcast %19 : vector<1x128xf32> to vector<8x128xf32>
      %30 = arith.subf %15, %29 : vector<8x128xf32>
      %cst_15 = arith.constant 9.99999974E-6 : f32
      %31 = vector.broadcast %cst_15 : f32 to vector<1x128xf32>
      %32 = arith.addf %28, %31 : vector<1x128xf32>
      %33 = math.rsqrt %32 : vector<1x128xf32>
      %34 = vector.broadcast %33 : vector<1x128xf32> to vector<8x128xf32>
      %35 = arith.mulf %30, %34 : vector<8x128xf32>
      %c1 = arith.constant 1 : index
      %c0_16 = arith.constant 0 : index
      %36 = vector.load %arg4[%c1, %c0_16] : memref<3x128xf32, #tpu.memory_space<vmem>>, vector<1x128xf32>
      %37 = vector.broadcast %36 : vector<1x128xf32> to vector<8x128xf32>
      %38 = arith.mulf %35, %37 : vector<8x128xf32>
      %c2 = arith.constant 2 : index
      %c0_17 = arith.constant 0 : index
      %39 = vector.load %arg4[%c2, %c0_17] : memref<3x128xf32, #tpu.memory_space<vmem>>, vector<1x128xf32>
      %40 = vector.broadcast %39 : vector<1x128xf32> to vector<8x128xf32>
      %41 = arith.addf %38, %40 : vector<8x128xf32>
      %cst_18 = arith.constant 0.000000e+00 : f32
      %42 = vector.broadcast %cst_18 : f32 to vector<8x128xf32>
      %43 = arith.maximumf %41, %42 : vector<8x128xf32>
      %c0_19 = arith.constant 0 : index
      %c0_20 = arith.constant 0 : index
      %44 = vector.load %arg5[%c0_19, %c0_20] : memref<8x128xf32, #tpu.memory_space<vmem>>, vector<8x128xf32>
      tpu.vector_store %arg5[%c0_19, %c0_20], %43 {strides = array<i32>} : memref<8x128xf32, #tpu.memory_space<vmem>>, vector<8x128xf32>,
    } else {
    }
    return
  }
  func.func @transform_0(%arg0: i32, %arg1: i32) -> (i32, i32) {
    %c0_i32 = arith.constant 0 : i32
    %c0_i32_0 = arith.constant 0 : i32
    %c0_i32_1 = arith.constant 0 : i32
    return %c0_i32, %c0_i32_0 : i32, i32
  }
  func.func @transform_1(%arg0: i32, %arg1: i32) -> (i32, i32) {
    %c0_i32 = arith.constant 0 : i32
    return %arg0, %arg1 : i32, i32
  }
  func.func @transform_2(%arg0: i32, %arg1: i32) -> (i32, i32) {
    %c0_i32 = arith.constant 0 : i32
    %c0_i32_0 = arith.constant 0 : i32
    return %c0_i32, %arg0 : i32, i32
  }
  func.func @transform_3(%arg0: i32, %arg1: i32) -> (i32, i32) {
    %c0_i32 = arith.constant 0 : i32
    %c0_i32_0 = arith.constant 0 : i32
    return %c0_i32, %arg0 : i32, i32
  }
}

</mosaic_0001>

<bundles_post_ra>
// kernel: tpu_custom_call.1
= control target key start
LH: loop header
LB: loop body
LE: loop exit
PB: predicated region body
PF: predicated region fallthrough
CT: control target
= control target key end

     0   :  { %8 = vsyncpa [#allocation3], 0  ;;  %s1055_s0 = inlined_call_operand.hbm [shape: f32[8,256], index: 0, kind: input, shape index: {}]   ;;  %s1056_s1 = inlined_call_operand.hbm [shape: f32[256,256], index: 1, kind: input, shape index: {}]   ;;  %s1057_s2 = inlined_call_operand.hbm [shape: f32[3,256], index: 2, kind: input, shape index: {}]   ;;  %s1058_s3 = inlined_call_operand.hbm [shape: f32[8,256], index: 3, kind: output, shape index: {}]  }
   0x1   :  { %9 = vsyncpa [#allocation6], 0 }
   0x2   :  { %11 = vsyncpa [#allocation6 + $0x1], 0 }
   0x3   :  { %12 = vsyncpa [#allocation4], 0 }
   0x4   :  { %14 = vsyncpa [#allocation4 + $0x1], 0  ;;  %s845_s12 = smov 0   ;;  %s847_s13 = smov 0  }
   0x5   :  { %s849_s14 = smov 0   ;;  %s851_s15 = smov 0  }
   0x6   :  { %s853_s16 = smov 0   ;;  %s855_s17 = smov 0  }
   0x7 LB: > { %s32_s18 = sadd.s32 1, %s813_s16  ;;  %s62_s19 = sadd.s32 1, %s805_s14  ;;  %s817_s17 = sphi %s855_s17, %s20_s17   ;;  %s813_s16 = sphi %s853_s16, %s1081_s16   ;;  %s809_s15 = sphi %s851_s15, %s1080_s15   ;;  %s805_s14 = sphi %s849_s14, %s1079_s14   ;;  %s801_s13 = sphi %s847_s13, %s1078_s13   ;;  %s797_s12 = sphi %s845_s12, %s1077_s12  }
   0x8   : > { %p34_p0 = scmp.ge.s32.totalorder %s32_s18, 2  ;;  %p69_p1 = scmp.ne.s32.totalorder %s805_s14, %s801_s13 }
   0x9   : > { %p70_p2 = scmp.eq.s32.totalorder %s817_s17, 0  ;;  %p595_p5 = scmp.lt.s32.totalorder %s817_s17, 2 }
   0xa   : > { %s1083_s18 = smov (%p34_p0, %s32_s18), 0  ;;  %s162_s21 = sand.u32 1, %s817_s17  }
   0xb   : > { %p71_p4 = por %p70_p2, %p69_p1  ;;  %s57_s20 = ssub.s32 %s813_s16, %s1083_s18 }
   0xc   : > { %p60_p6 = scmp.eq.s32.totalorder %s57_s20, 0  ;;  %s164_s22 = sand.u32 1, %s805_s14  }
   0xd   : > { %s568_s23 = sshll.u32 %s813_s16, 12  ;;  %s549_s25 = sshll.u32 %s164_s22, 8 }
   0xe   : > { %s893_s24 = scalar_select %p60_p6, %s805_s14, %s62_s19  }
   0xf   : > { %s175_s28 = scalar_lea.hbm %s1056_s1, %s568_s23  ;;  %p900_p7 = pnand %p595_p5, %p71_p4 }
  0x10   : > { %s166_s30 = scalar_lea.vmem [#allocation5], %s549_s25  ;;  %s904_s5 = scalar_lea.sflag [#allocation6], %s162_s21 }
  0x11   : > { %s176_s4 = sshll.u32 %s166_s30, 4  ;;  %p1059_p8 = pneg %p900_p7  ;;  %s177_s4 = int_to_ptr.vmem [resolvable:$true] %s176_s4 }
  0x12   : > { %s664_s6 = scalar_lea.vmem %s177_s4, 4096  ;;  %s819_s7 = smov [#allocation5]  }
  0x13   : > { %p665_p9 = scmp.ne.s32.totalorder %s177_s4, %s664_s6  ;;  %s669_s8 = sshll.u32 %s819_s7, 4  ;;  %s670_s8 = int_to_ptr.vmem [resolvable:$false] %s669_s8 }
  0x14   : > { %s671_s9 = scalar_lea.vmem %s670_s8, 8192  ;;  %p672_p12 = scmp.lt.s32.totalorder %s177_s4, %s670_s8 }
  0x15   : > { %p667_p10 = pnand %p665_p9, %p1059_p8  ;;  %p673_p13 = scmp.lt.s32.totalorder %s671_s9, %s664_s6 }
  0x17   : > { %p668_p11 = pneg %p667_p10  ;;  %p674_p0 = por %p673_p13, %p672_p12 }
  0x19   : > { %p675_p2 = pnand %p674_p0, %p668_p11 }
  0x1b   : > { %678 = shalt.err (!%p675_p2)
}
  0x1c   : > { %s820_s10 = smov 256   ;;  %s821_s11 = smov 16  }
  0x1d   : > { %586 = dma.hbm_to_vmem [thread:$0]  (!%p900_p7), %s175_s28, 4096, %s177_s4, %s904_s5, %s820_s10, %s820_s10, %s821_s11  }
  0x1e   : > { %s915_s19 = sadd.s32 4294967295, %s817_s17   ;;  %s545_s20 = sadd.s32 4294967294, %s817_s17  }
  0x1f   : > { %p75_p4 = scmp.ne.s32.totalorder %s801_s13, %s797_s12  ;;  %p1061_p5 = scmp.eq.s32.totalorder %s915_s19, 0 }
  0x20   : > { %p125_p6 = scmp.eq.s32.totalorder %s915_s19, 1  ;;  %p131_p9 = scmp.eq.s32.totalorder %s545_s20, 1 }
  0x21   : > { %p546_p10 = scmp.ge.s32.totalorder %s817_s17, 1  ;;  %p925_p11 = por %p1061_p5, %p75_p4 }
  0x22   : > { %p932_p12 = por %p125_p6, %p69_p1  ;;  %p936_p13 = por %p131_p9, %p75_p4 }
  0x23   : > { %s1065_s21 = scalar_select %p925_p11, 1, 0 }
  0x24   : > { %s1066_s23 = scalar_select %p932_p12, 1, 0 }
  0x25   : > { %s1067_s25 = scalar_select %p936_p13, 1, 0 }
  0x26   : > { %p138_p0 = scmp.lt.s32.totalorder %s817_s17, 3  ;;  %s822_s27 = smov [#allocation2]  }
  0x27   : > { %s151_s28 = sshll.u32 %s822_s27, 4  ;;  %s553_s30 = sshll.u32 %s164_s22, 2  ;;  %s152_s28 = int_to_ptr.vmem [resolvable:$true] %s151_s28 }
  0x28   : > { %p941_p2 = pnand %p546_p10, %p138_p0  ;;  %s554_s4 = sshll.u32 %s813_s16, 6 }
  0x29   : > { %s190_s6 = scalar_lea.vmem [#allocation7], %s553_s30  ;;  %s195_s10 = scalar_lea.hbm %s1057_s2, %s554_s4 }
  0x2a   : > { %s1068_s26 = scalar_select %p941_p2, 1, 0 }
  0x2b   : > { %p579_p3 = pneg %p941_p2  ;;  %s197_s7 = sshll.u32 %s190_s6, 4  ;;  %s198_s7 = int_to_ptr.vmem [resolvable:$true] %s197_s7 }
  0x2c   : > { %s690_s11 = scalar_lea.vmem %s152_s28, 256  ;;  %p698_p0 = scmp.lt.s32.totalorder %s152_s28, %s152_s28 }
  0x2d   : > { %p580_p1 = pnand %p579_p3, %p1061_p5  ;;  %p691_p6 = scmp.ne.s32.totalorder %s152_s28, %s690_s11 }
  0x2e   : > { %p699_p8 = scmp.lt.s32.totalorder %s690_s11, %s690_s11 }
  0x2f   : > { %p681_p4 = pneg %p580_p1 }
  0x30   : > { %p700_p13 = por %p699_p8, %p698_p0 }
  0x31   : > { %p693_p9 = pnand %p691_p6, %p681_p4 }
  0x33   : > { %p694_p10 = pneg %p693_p9 }
  0x35   : > { %p701_p12 = pnand %p700_p13, %p694_p10 }
  0x37   : > { %704 = shalt.err (!%p701_p12)
}
  0x38   : > { %582 = dma.hbm_to_vmem [thread:$0]  (!%p580_p1), %s1055_s0, 256, %s152_s28, [#allocation3]  }
  0x39   : > { %s718_s27 = scalar_lea.vmem %s198_s7, 64  ;;  %p1069_p5 = pneg %p900_p7 }
  0x3a   : > { %p719_p3 = scmp.ne.s32.totalorder %s198_s7, %s718_s27  ;;  %s823_s30 = smov [#allocation7]  }
  0x3b   : > { %s723_s4 = sshll.u32 %s823_s30, 4  ;;  %s724_s4 = int_to_ptr.vmem [resolvable:$false] %s723_s4 }
  0x3c   : > { %p721_p11 = pnand %p719_p3, %p1069_p5  ;;  %s725_s6 = scalar_lea.vmem %s724_s4, 128 }
  0x3d   : > { %p726_p4 = scmp.lt.s32.totalorder %s198_s7, %s724_s4  ;;  %p727_p6 = scmp.lt.s32.totalorder %s725_s6, %s718_s27 }
  0x3e   : > { %p722_p2 = pneg %p721_p11 }
  0x3f   : > { %p728_p8 = por %p727_p6, %p726_p4 }
  0x41   : > { %p729_p13 = pnand %p728_p8, %p722_p2 }
  0x43   : > { %732 = shalt.err (!%p729_p13)
}
  0x44   : > { %589 = dma.hbm_to_vmem [thread:$0]  (!%p900_p7), %s195_s10, 64, %s198_s7, %s904_s5  }
  0x45   : > { %p1070_p12 = scmp.ne.s32.totalorder %s1068_s26, 0 }
  0x46   : > { %p1071_p1 = scmp.eq.s32.totalorder (!%p1070_p12), %s915_s19, 0 }
  0x47   : > { %206 = sbr.rel (%p1070_p12) target bundleno = 411 (0x19b), region = 32 }
  0x4c   : > { %784 = dma.done.wait (%p1071_p1), [#allocation3], 256   ;;  %p1072_p5 = pmov %p1071_p1 }
  0x4d   : > { %s212_s28 = sand.u32 1, %s915_s19   ;;  %s972_s8 = sand.u32 1, %s801_s13  }
  0x4e   : > { %786 = vsyncadd (%p1072_p5), [#allocation3], 4294967040  ;;  %s557_s9 = sshll.u32 %s972_s8, 8  ;;  %s213_s29 = scalar_lea.sflag [#allocation6], %s212_s28 }
  0x4f   : > { %s975_s11 = scalar_lea.vmem [#allocation5], %s557_s9  ;;  %p1073_p7 = scmp.ne.s32.totalorder %s1065_s21, 0 }
  0x51   : > { %788 = dma.done.wait (%p1073_p7), %s213_s29, 4160  }
  0x52   : > { %790 = vsyncadd (%p1073_p7), %s213_s29, 4294963136  ;;  %v304_v0 = vld [vmem:[%s975_s11 + $0xf8] sm:$0xff]  ;;  %v303_v1 = vld [vmem:[%s975_s11 + $0xf0] sm:$0xff]  ;;  %s558_s5 = sshll.u32 %s972_s8, 2  ;;  %s559_s21 = sshll.u32 %s972_s8, 3 }
  0x53   : > { %v302_v2 = vld [vmem:[%s975_s11 + $0xe8] sm:$0xff]  ;;  %305 = vmatprep.subr.mxu0 %v304_v0  ;;  %v301_v3 = vld [vmem:[%s975_s11 + $0xe0] sm:$0xff]  ;;  %v300_v4 = vld [vmem:[%s975_s11 + $0xd8] sm:$0xff]  ;;  %s225_s19 = scalar_lea.vmem [#allocation7], %s558_s5  ;;  %s564_s26 = sshll.u32 %s809_s15, 7 }
  0x54   : > { %306 = vmatpush1.xpose.msra.mxu0 %v303_v1  ;;  %v299_v5 = vld [vmem:[%s975_s11 + $0xd0] sm:$0xff]  ;;  %v298_v6 = vld [vmem:[%s975_s11 + $0xc8] sm:$0xff]  ;;  %v271_v7 = vld [vmem:[#allocation2 + $0x8] sm:$0xff]  ;;  %s252_s7 = scalar_lea.vmem [#allocation8], %s559_s21  ;;  %s427_s27 = scalar_lea.hbm %s1058_s3, %s564_s26 }
  0x55   : > { %307 = vmatprep.subr.mxu0 %v302_v2  ;;  %v297_v8 = vld [vmem:[%s975_s11 + $0xc0] sm:$0xff]  ;;  %369 = vmatprep.mubr.f32.mxu0 %v271_v7  ;;  %v296_v9 = vld [vmem:[%s975_s11 + $0xb8] sm:$0xff]  ;;  %v295_v10 = vld [vmem:[%s975_s11 + $0xb0] sm:$0xff]  ;;  %s429_s10 = sshll.u32 %s252_s7, 4  ;;  %s416_s30 = scalar_lea.sflag [#allocation4], %s972_s8  ;;  %s430_s10 = int_to_ptr.vmem [resolvable:$true] %s429_s10 }
  0x56   : > { %v294_v11 = vld [vmem:[%s975_s11 + $0xa8] sm:$0xff]  ;;  %v293_v12 = vld [vmem:[%s975_s11 + $0xa0] sm:$0xff]  ;;  %v292_v13 = vld [vmem:[%s975_s11 + $0x98] sm:$0xff]  ;;  %s733_s4 = scalar_lea.vmem %s430_s10, 128  ;;  %p1074_p2 = scmp.ne.s32.totalorder %s1066_s23, 0 }
  0x57   : > { %v291_v14 = vld [vmem:[%s975_s11 + $0x90] sm:$0xff]  ;;  %v290_v15 = vld [vmem:[%s975_s11 + $0x88] sm:$0xff]  ;;  %v289_v16 = vld [vmem:[%s975_s11 + $0x80] sm:$0xff]  ;;  %p734_p11 = scmp.ne.s32.totalorder %s430_s10, %s733_s4  ;;  %s824_s6 = smov [#allocation8]  }
  0x58   : > { %308 = vmatpush1.xpose.msra.mxu0 %v301_v3  ;;  %v288_v17 = vld [vmem:[%s975_s11 + $0x78] sm:$0xff]  ;;  %v287_v18 = vld [vmem:[%s975_s11 + $0x70] sm:$0xff]  ;;  %v286_v19 = vld [vmem:[%s975_s11 + $0x68] sm:$0xff]  ;;  %s737_s28 = sshll.u32 %s824_s6, 4  ;;  %s738_s28 = int_to_ptr.vmem [resolvable:$false] %s737_s28 }
  0x59   : > { %309 = vmatprep.subr.mxu0 %v300_v4  ;;  %v285_v20 = vld [vmem:[%s975_s11 + $0x60] sm:$0xff]  ;;  %v284_v21 = vld [vmem:[%s975_s11 + $0x58] sm:$0xff]  ;;  %v283_v22 = vld [vmem:[%s975_s11 + $0x50] sm:$0xff]  ;;  %p735_p9 = pnand %p734_p11, %p1074_p2  ;;  %s739_s15 = scalar_lea.vmem %s738_s28, 256 }
  0x5a   : > { %v282_v23 = vld [vmem:[%s975_s11 + $0x48] sm:$0xff]  ;;  %v281_v24 = vld [vmem:[%s975_s11 + $0x40] sm:$0xff]  ;;  %v280_v25 = vld [vmem:[%s975_s11 + $0x38] sm:$0xff]  ;;  %p740_p0 = scmp.lt.s32.totalorder %s430_s10, %s738_s28  ;;  %p741_p3 = scmp.lt.s32.totalorder %s739_s15, %s733_s4 }
  0x5b   : > { %v279_v26 = vld [vmem:[%s975_s11 + $0x30] sm:$0xff]  ;;  %v278_v27 = vld [vmem:[%s975_s11 + $0x28] sm:$0xff]  ;;  %v277_v28 = vld [vmem:[%s975_s11 + $0x20] sm:$0xff]  ;;  %p736_p10 = pneg %p735_p9 }
  0x5c   : > { %310 = vmatpush1.xpose.msra.mxu0 %v299_v5  ;;  %v276_v29 = vld [vmem:[%s975_s11 + $0x18] sm:$0xff]  ;;  %v275_v30 = vld [vmem:[%s975_s11 + $0x10] sm:$0xff]  ;;  %v274_v31 = vld [vmem:[%s975_s11 + $0x8] sm:$0xff]  ;;  %p742_p4 = por %p741_p3, %p740_p0 }
  0x5d   : > { %311 = vmatprep.subr.mxu0 %v298_v6  ;;  %v273_v32 = vld [vmem:[%s975_s11] sm:$0xff]  ;;  %v270_v33 = vld [vmem:[#allocation2] sm:$0xff] }
  0x5e   : > { %v560_v34 = vld [vmem:[%s225_s19] ss:$0 sm:$0xff]  ;;  %v561_v56 = vld [vmem:[%s225_s19 + $0x1] ss:$0 sm:$0xff]  ;;  %v562_v58 = vld [vmem:[%s225_s19 + $0x2] ss:$0 sm:$0xff]  ;;  %p743_p6 = pnand %p742_p4, %p736_p10 }
  0x60   : > { %312 = vmatpush1.xpose.msra.mxu0 %v297_v8 }
  0x61   : > { %313 = vmatprep.subr.mxu0 %v296_v9 }
  0x64   : > { %314 = vmatpush1.xpose.msra.mxu0 %v295_v10 }
  0x65   : > { %315 = vmatprep.subr.mxu0 %v294_v11 }
  0x68   : > { %316 = vmatpush1.xpose.msra.mxu0 %v293_v12 }
  0x69   : > { %317 = vmatprep.subr.mxu0 %v292_v13 }
  0x6c   : > { %318 = vmatpush1.xpose.msra.mxu0 %v291_v14 }
  0x6d   : > { %319 = vmatprep.subr.mxu0 %v290_v15 }
  0x70   : > { %320 = vmatpush1.xpose.msra.mxu0 %v289_v16 }
  0x71   : > { %321 = vmatprep.subr.mxu0 %v288_v17 }
  0x74   : > { %322 = vmatpush1.xpose.msra.mxu0 %v287_v18 }
  0x75   : > { %323 = vmatprep.subr.mxu0 %v286_v19 }
  0x78   : > { %324 = vmatpush1.xpose.msra.mxu0 %v285_v20 }
  0x79   : > { %325 = vmatprep.subr.mxu0 %v284_v21 }
  0x7c   : > { %326 = vmatpush1.xpose.msra.mxu0 %v283_v22 }
  0x7d   : > { %327 = vmatprep.subr.mxu0 %v282_v23 }
  0x80   : > { %328 = vmatpush1.xpose.msra.mxu0 %v281_v24 }
  0x81   : > { %329 = vmatprep.subr.mxu0 %v280_v25 }
  0x84   : > { %330 = vmatpush1.xpose.msra.mxu0 %v279_v26 }
  0x85   : > { %331 = vmatprep.subr.mxu0 %v278_v27 }
  0x88   : > { %332 = vmatpush1.xpose.msra.mxu0 %v277_v28 }
  0x89   : > { %333 = vmatprep.subr.mxu0 %v276_v29 }
  0x8c   : > { %334 = vmatpush1.xpose.msra.mxu0 %v275_v30 }
  0x8d   : > { %335 = vmatprep.subr.mxu0 %v274_v31 }
  0x90   : > { %336 = vmatpush1.xpose.msra.mxu0 %v273_v32 }
  0x93   : > { %370 = vmatmul.mubr.f32.vlgmr.msra.gmra.mxu0 %v270_v33 }
 0x153   : > { %v371_v35 = vpop.f32.mrf.mxu0 }
 0x154   : > { %v375_v36 = vadd.f32 %v560_v34, %v371_v35 }
 0x155   : > { %v373_v37 = vpop.f32.mrf.mxu0 }
 0x156   : > { %v381_v38 = vrot.slane %v375_v36, 4 }
 0x158   : > { %v382_v39 = vadd.f32 %v381_v38, %v375_v36 }
 0x15a   : > { %v383_v40 = vrot.slane %v382_v39, 2 }
 0x15c   : > { %v384_v41 = vadd.f32 %v383_v40, %v382_v39 }
 0x15e   : > { %v385_v42 = vrot.slane %v384_v41, 1 }
 0x160   : > { %v386_v43 = vadd.f32 %v385_v42, %v384_v41 }
 0x162   : > { %v388_v44 = vmul.f32 0.125, %v386_v43 }
 0x164   : > { %v389_v45 = vsub.f32 %v375_v36, %v388_v44 }
 0x166   : > { %v390_v46 = vmul.f32 %v389_v45, %v389_v45 }
 0x168   : > { %v391_v47 = vrot.slane %v390_v46, 4 }
 0x16a   : > { %v392_v48 = vadd.f32 %v391_v47, %v390_v46 }
 0x16c   : > { %v393_v49 = vrot.slane %v392_v48, 2 }
 0x16e   : > { %v394_v50 = vadd.f32 %v393_v49, %v392_v48 }
 0x170   : > { %v395_v51 = vrot.slane %v394_v50, 1 }
 0x172   : > { %v396_v52 = vadd.f32 %v395_v51, %v394_v50 }
 0x174   : > { %v397_v53 = vmul.f32 0.125, %v396_v52 }
 0x176   : > { %v398_v54 = vadd.f32 1e-05, %v397_v53 }
 0x178   : > { %649 = vrsqrt.f32 %v398_v54 }
 0x185   : > { %v650_v55 = vpop.eup %649 }
 0x186   : > { %v400_v57 = vmul.f32 %v650_v55, %v389_v45 }
 0x188   : > { %v406_v59 = vmul.f32 %v561_v56, %v400_v57 }
 0x18a   : > { %v412_v60 = vadd.f32 %v562_v58, %v406_v59 }
 0x18c   : > { %v413_v61 = vmax.f32 %v412_v60, 0.0 }
 0x18e   : > { %414 = vst [vmem:[%s252_s7] sm:$0xff] %v413_v61 }
 0x18f   : > { %746 = shalt.err (!%p743_p6)
}
 0x190   : > { %s747_s9 = scalar_lea.hbm %s427_s27, 128  ;;  %s751_s11 = scalar_lea.hbm %s1058_s3, 256 }
 0x191   : > { %p748_p8 = scmp.ne.s32.totalorder %s427_s27, %s747_s9  ;;  %p752_p1 = scmp.lt.s32.totalorder %s427_s27, %s1058_s3 }
 0x192   : > { %p753_p5 = scmp.lt.s32.totalorder %s751_s11, %s747_s9 }
 0x193   : > { %p749_p13 = pnand %p748_p8, %p1074_p2 }
 0x194   : > { %p754_p7 = por %p753_p5, %p752_p1 }
 0x195   : > { %p750_p12 = pneg %p749_p13 }
 0x197   : > { %p755_p11 = pnand %p754_p7, %p750_p12 }
 0x199   : > { %758 = shalt.err (!%p755_p11)
}
 0x19a   : > { %577 = dma.vmem_to_hbm [thread:$0]  (%p1074_p2), %s430_s10, 128, %s427_s27, %s416_s30  }
 0x19b PF: > { %s441_s21 = sand.u32 1, %s797_s12   ;;  %p1075_p9 = scmp.ne.s32.totalorder %s1067_s25, 0 }
 0x19c   : > { %p1076_p10 = scmp.ge.s32.totalorder %s817_s17, 2  ;;  %s442_s26 = scalar_lea.sflag [#allocation4], %s441_s21 }
 0x19e   : > { %p591_p0 = pnand %p1076_p10, %p1075_p9 }
 0x1a0   : > { %p592_p3 = pneg %p591_p0 }
 0x1a2   : > { %792 = dma.done.wait (%p592_p3), %s442_s26, 128  }
 0x1a3   : > { %794 = vsyncadd (%p592_p3), %s442_s26, 4294967168  ;;  %s20_s17 = sadd.s32 1, %s817_s17   ;;  %s1077_s12 = smov %s801_s13 }
 0x1a4   : > { %p17_p4 = scmp.ge.s32.totalorder %s20_s17, 4   ;;  %s1078_s13 = smov %s805_s14 }
 0x1a5   : > { %s1079_s14 = smov %s893_s24  ;;  %s1080_s15 = smov %s813_s16 }
 0x1a6   : > { %s1081_s16 = smov %s1083_s18  ;;  %19 = sbr.rel (!%p17_p4) target bundleno = 7 (0x7), region = 102 }
 0x1ab   :  { %447 = vsyncpa [#allocation3], 1 }
 0x1ac   :  { %449 = vsyncpa [#allocation3 + $0x1], 1 }
 0x1ad   :  { %450 = vsyncpa [#allocation6], 1 }
 0x1ae   :  { %452 = vsyncpa [#allocation6 + $0x1], 1 }
 0x1af   :  { %453 = vsyncpa [#allocation4], 1 }
 0x1b0   :  { %455 = vsyncpa [#allocation4 + $0x1], 1 }

</bundles_post_ra>
